<compile_context>
chip_gen: v6e
topology: v6e:2x2x1
jax: 0.10.0
libtpu: 0.0.40
codegen_flags: <defaults>
</compile_context>

<pallas_src>
import functools

import jax
import jax.numpy as jnp
from jax.experimental import pallas as pl
from jax.experimental.pallas import tpu as pltpu

EPS_LN = 1e-5
EPS_BN = 1e-5

# Conservative scoped-VMEM cap: below v7x's 64 MiB/TC physical VMEM and well
# below v5e/v6e's 128 MiB, yet far above what these tiles need.
VMEM_LIMIT = 48 * 1024 * 1024


def _round_up(x, m):
    return ((x + m - 1) // m) * m


def _row_tile(n_rows, cap):
    # Single full block if it fits under `cap`, else `cap` (multiple of 8);
    # Pallas masks the partial final block.
    return n_rows if n_rows <= cap else cap


def _compiler_params():
    return pltpu.CompilerParams(
        dimension_semantics=("parallel",),   # independent token/batch axis
        vmem_limit_bytes=VMEM_LIMIT,
    )


def _layernorm(v, g, b):
    mu = jnp.mean(v, axis=-1, keepdims=True)
    var = jnp.mean(jnp.square(v - mu), axis=-1, keepdims=True)
    return (v - mu) * jax.lax.rsqrt(var + EPS_LN) * g + b


# ---------------------------------------------------------------------------
# Kernel 1: Conv1d (im2col matmul) + folded BatchNorm1d (eval) + ReLU
#   grid over token tiles; weights resident via constant index_map.
# ---------------------------------------------------------------------------
def conv_bn_relu_kernel(p_ref, w_ref, b_ref, o_ref):
    p = p_ref[...].astype(jnp.bfloat16)                       # (T, Cin*K)
    y = jnp.dot(p, w_ref[...], preferred_element_type=jnp.float32) + b_ref[...]
    o_ref[...] = jnp.maximum(y, 0.0)


def conv_bn_relu(patches, w_eff, b_eff):
    n_tok, ck = patches.shape
    e = w_eff.shape[1]
    tile = _row_tile(n_tok, 512)
    return pl.pallas_call(
        conv_bn_relu_kernel,
        out_shape=jax.ShapeDtypeStruct((n_tok, e), jnp.float32),
        grid=(pl.cdiv(n_tok, tile),),
        in_specs=[
            pl.BlockSpec((tile, ck), lambda i: (i, 0)),
            pl.BlockSpec((ck, e), lambda i: (0, 0)),        # resident weight
            pl.BlockSpec((1, e), lambda i: (0, 0)),         # resident bias
        ],
        out_specs=pl.BlockSpec((tile, e), lambda i: (i, 0)),
        compiler_params=_compiler_params(),
    )(patches, w_eff, b_eff)


# ---------------------------------------------------------------------------
# Kernel 2a: pre-norm self-attention block (grid over batch)
#   src = src + MHA(LN1(src))      -- heads batched in single dot_generals
# ---------------------------------------------------------------------------
def attn_kernel(x_ref, ln1_g_ref, ln1_b_ref, wqkv_ref, bqkv_ref, wo3_ref, bo_ref,
                o_ref, *, num_heads):
    x = x_ref[0]                                               # (L, E) f32
    L, E = x.shape
    H = num_heads
    Hd = E // H

    x2 = _layernorm(x, ln1_g_ref[...], ln1_b_ref[...])
    qkv = (jnp.dot(x2.astype(jnp.bfloat16), wqkv_ref[...],
                   preferred_element_type=jnp.float32) + bqkv_ref[...])  # (L, 3E)

    # Head relayout: cheap slice+stack copies; all matmuls below are batched
    # over the leading head dim (canonical batched dot_general form).
    q3 = jnp.stack([qkv[:, h * Hd:(h + 1) * Hd]
                    for h in range(H)], axis=0).astype(jnp.bfloat16)       # (H,L,Hd)
    k3 = jnp.stack([qkv[:, E + h * Hd:E + (h + 1) * Hd]
                    for h in range(H)], axis=0).astype(jnp.bfloat16)
    v3 = jnp.stack([qkv[:, 2 * E + h * Hd:2 * E + (h + 1) * Hd]
                    for h in range(H)], axis=0).astype(jnp.bfloat16)

    s = jnp.einsum("hld,hmd->hlm", q3, k3,
                   preferred_element_type=jnp.float32) * (1.0 / (Hd ** 0.5))
    s = s - jnp.max(s, axis=-1, keepdims=True)                 # f32 softmax stats
    p = jnp.exp(s)
    p = p * pl.reciprocal(jnp.sum(p, axis=-1, keepdims=True), approx=True)

    ctx = jnp.einsum("hlm,hmd->hld", p.astype(jnp.bfloat16), v3,
                     preferred_element_type=jnp.float32)       # (H, L, Hd)
    proj = jnp.einsum("hld,hde->hle", ctx.astype(jnp.bfloat16), wo3_ref[...],
                      preferred_element_type=jnp.float32)      # (H, L, E)
    attn = jnp.sum(proj, axis=0) + bo_ref[...]                 # (L, E)

    o_ref[0] = x + attn
    # TODO(synk): for L >> 128 switch to a flash-style online-softmax loop over
    # K/V tiles instead of the full (L, L) score matrix per head.


def attn_block(x3, lp, num_heads):
    B, L, E = x3.shape
    H = num_heads
    Hd = E // H
    kern = functools.partial(attn_kernel, num_heads=H)
    return pl.pallas_call(
        kern,
        out_shape=jax.ShapeDtypeStruct((B, L, E), jnp.float32),
        grid=(B,),
        in_specs=[
            pl.BlockSpec((1, L, E), lambda b: (b, 0, 0)),
            pl.BlockSpec((1, E), lambda b: (0, 0)),
            pl.BlockSpec((1, E), lambda b: (0, 0)),
            pl.BlockSpec((E, 3 * E), lambda b: (0, 0)),         # resident
            pl.BlockSpec((1, 3 * E), lambda b: (0, 0)),
            pl.BlockSpec((H, Hd, E), lambda b: (0, 0, 0)),      # resident
            pl.BlockSpec((1, E), lambda b: (0, 0)),
        ],
        out_specs=pl.BlockSpec((1, L, E), lambda b: (b, 0, 0)),
        compiler_params=_compiler_params(),
    )(x3, lp["ln1_g"], lp["ln1_b"], lp["wqkv_t"], lp["bqkv"],
      lp["wo3"], lp["bo"])


# ---------------------------------------------------------------------------
# Kernel 2b: pre-norm feed-forward block (grid over token tiles)
#   src = src + W2 @ relu(W1 @ LN2(src))
# ---------------------------------------------------------------------------
def ffn_kernel(x_ref, ln2_g_ref, ln2_b_ref, w1_ref, b1_ref, w2_ref, b2_ref, o_ref):
    x = x_ref[...]                                             # (T, E) f32
    x2 = _layernorm(x, ln2_g_ref[...], ln2_b_ref[...])
    h = (jnp.dot(x2.astype(jnp.bfloat16), w1_ref[...],
                 preferred_element_type=jnp.float32) + b1_ref[...])
    h = jnp.maximum(h, 0.0)
    y = (jnp.dot(h.astype(jnp.bfloat16), w2_ref[...],
                 preferred_element_type=jnp.float32) + b2_ref[...])
    o_ref[...] = x + y


def ffn_block(x_flat, lp):
    n_tok, e = x_flat.shape
    f = lp["w1_t"].shape[1]
    # Token tile: intermediate is tile x F f32 (<= 4 MiB at tile=512, F=2048),
    # plus resident bf16 w1/w2 -- comfortably under the 48 MiB VMEM cap on v7x.
    tile = _row_tile(n_tok, 512)
    return pl.pallas_call(
        ffn_kernel,
        out_shape=jax.ShapeDtypeStruct((n_tok, e), jnp.float32),
        grid=(pl.cdiv(n_tok, tile),),
        in_specs=[
            pl.BlockSpec((tile, e), lambda i: (i, 0)),
            pl.BlockSpec((1, e), lambda i: (0, 0)),
            pl.BlockSpec((1, e), lambda i: (0, 0)),
            pl.BlockSpec((e, f), lambda i: (0, 0)),             # resident
            pl.BlockSpec((1, f), lambda i: (0, 0)),
            pl.BlockSpec((f, e), lambda i: (0, 0)),             # resident
            pl.BlockSpec((1, e), lambda i: (0, 0)),
        ],
        out_specs=pl.BlockSpec((tile, e), lambda i: (i, 0)),
        compiler_params=_compiler_params(),
    )(x_flat, lp["ln2_g"], lp["ln2_b"], lp["w1_t"], lp["b1"],
      lp["w2_t"], lp["b2"])


# ---------------------------------------------------------------------------
# Kernel 3: final classifier.  The PyTorch permute(1,2,0)+flatten is folded
# into the (pre-permuted, class-padded) weight, so the input is just the
# (B, L*E) activation slab (no transpose) and the output is lane-dense.
# ---------------------------------------------------------------------------
def fc_kernel(x_ref, w_ref, b_ref, o_ref):
    o_ref[...] = (jnp.dot(x_ref[...].astype(jnp.bfloat16), w_ref[...],
                          preferred_element_type=jnp.float32) + b_ref[...])


def fc(x2d, w_perm, b_pad):
    n_rows, k = x2d.shape
    cp = w_perm.shape[1]
    tile = _row_tile(n_rows, 256)
    return pl.pallas_call(
        fc_kernel,
        out_shape=jax.ShapeDtypeStruct((n_rows, cp), jnp.float32),
        grid=(pl.cdiv(n_rows, tile),),
        in_specs=[
            pl.BlockSpec((tile, k), lambda i: (i, 0)),
            pl.BlockSpec((k, cp), lambda i: (0, 0)),            # resident
            pl.BlockSpec((1, cp), lambda i: (0, 0)),
        ],
        out_specs=pl.BlockSpec((tile, cp), lambda i: (i, 0)),
        compiler_params=_compiler_params(),
    )(x2d, w_perm, b_pad)


# ---------------------------------------------------------------------------
# Parameter init (deterministic, synthetic, torch-style layouts) + host prep
# ---------------------------------------------------------------------------
def init_params(key, in_channels, embed_dim, num_heads, num_layers,
                time_series_length, num_classes, dim_feedforward=2048):
    keys = iter(jax.random.split(key, 8 + 12 * num_layers))

    def nrm(shape, s=0.05):
        return jax.random.normal(next(keys), shape, jnp.float32) * s

    E, Cin, L, F = embed_dim, in_channels, time_series_length, dim_feedforward
    params = {
        "conv_w": nrm((E, Cin, 3)),            # torch Conv1d weight layout
        "conv_b": nrm((E,)),
        "bn_g": 1.0 + nrm((E,)),
        "bn_b": nrm((E,)),
        "bn_mean": jnp.zeros((E,), jnp.float32),   # BN running statistics
        "bn_var": jnp.ones((E,), jnp.float32),
        "fc_w": nrm((num_classes, E * L)),     # torch Linear weight layout
        "fc_b": nrm((num_classes,)),
        "layers": [],
    }
    for _ in range(num_layers):
        params["layers"].append(dict(
            ln1_g=1.0 + nrm((1, E)), ln1_b=nrm((1, E)),
            wqkv_t=nrm((E, 3 * E)), bqkv=nrm((1, 3 * E)),
            wo_t=nrm((E, E)), bo=nrm((1, E)),
            ln2_g=1.0 + nrm((1, E)), ln2_b=nrm((1, E)),
            w1_t=nrm((E, F)), b1=nrm((1, F)),
            w2_t=nrm((F, E)), b2=nrm((1, E)),
        ))
    return params


def prepare_params(params, num_heads, time_series_length):
    """Host-side, one-time: fold BN into conv, pre-cast matmul weights to bf16,
    reshape wo per head, fold the final permute into the FC weight, pad FC
    classes to a lane-dense multiple of 128."""
    E, Cin, K = params["conv_w"].shape
    L = time_series_length
    H = num_heads
    Hd = E // H

    # Conv + BatchNorm1d(eval) folding:  BN(conv(x)) = matmul*scale + shift
    bn_scale = params["bn_g"] * jax.lax.rsqrt(params["bn_var"] + EPS_BN)
    w_conv = params["conv_w"].reshape(E, Cin * K).T                     # (Cin*K, E)
    conv_w_eff = (w_conv * bn_scale[None, :]).astype(jnp.bfloat16)
    conv_b_eff = ((params["conv_b"] - params["bn_mean"]) * bn_scale
                  + params["bn_b"]).reshape(1, E)

    layers = []
    for lp in params["layers"]:
        layers.append(dict(
            ln1_g=lp["ln1_g"], ln1_b=lp["ln1_b"],
            wqkv_t=lp["wqkv_t"].astype(jnp.bfloat16),
            bqkv=lp["bqkv"],
            wo3=lp["wo_t"].reshape(H, Hd, E).astype(jnp.bfloat16),
            bo=lp["bo"],
            ln2_g=lp["ln2_g"], ln2_b=lp["ln2_b"],
            w1_t=lp["w1_t"].astype(jnp.bfloat16), b1=lp["b1"],
            w2_t=lp["w2_t"].astype(jnp.bfloat16), b2=lp["b2"],
        ))

    # FC: torch does (B,L,E)-> permute ->(B,E,L)-> flatten (index e*L+l).
    # Permute the weight instead so the activation needs only a reshape.
    C = params["fc_w"].shape[0]
    w_perm = params["fc_w"].reshape(C, E, L).transpose(2, 1, 0).reshape(L * E, C)
    Cp = _round_up(C, 128)                                 # lane-dense output
    fc_w_perm = jnp.zeros((L * E, Cp), jnp.float32).at[:, :C].set(w_perm)
    fc_w_perm = fc_w_perm.astype(jnp.bfloat16)
    fc_b_pad = jnp.zeros((1, Cp), jnp.float32).at[0, :C].set(params["fc_b"])

    return dict(conv_w_eff=conv_w_eff, conv_b_eff=conv_b_eff, layers=layers,
                fc_w_perm=fc_w_perm, fc_b_pad=fc_b_pad)


# ---------------------------------------------------------------------------
# Full forward pass (glue in plain JAX, hot paths in Pallas)
# ---------------------------------------------------------------------------
def convformer_forward(x, kparams, num_heads, num_classes):
    B, Cin, L = x.shape
    E = kparams["conv_w_eff"].shape[1]

    # im2col for Conv1d(kernel=3, padding=1)
    xpad = jnp.pad(x, ((0, 0), (0, 0), (1, 1)))
    patches = jnp.stack([xpad[:, :, k:k + L] for k in range(3)], axis=-1)  # (B,Cin,L,3)
    patches = jnp.transpose(patches, (0, 2, 1, 3)).reshape(B * L, Cin * 3)
    # TODO(synk): at realistic sizes also pad E (and the Cin*3 contraction dim)
    # to 128 lanes with head-aware weight relayout for fully lane-dense vregs.

    feat = conv_bn_relu(patches, kparams["conv_w_eff"], kparams["conv_b_eff"])

    feat3 = feat.reshape(B, L, E)
    for lp in kparams["layers"]:
        feat3 = attn_block(feat3, lp, num_heads)                    # grid over B
        feat3 = ffn_block(feat3.reshape(B * L, E), lp).reshape(B, L, E)

    # Final permute already folded into fc_w_perm: just a reshape (no HBM transpose).
    x2d = feat3.reshape(B, L * E)
    logits_pad = fc(x2d, kparams["fc_w_perm"], kparams["fc_b_pad"])
    return logits_pad[:, :num_classes]


if __name__ == "__main__":
    # Convformer(in_channels=4, num_classes=5, embed_dim=32, num_heads=4,
    #            num_layers=2, time_series_length=16)
    B, Cin, L = 2, 4, 16
    E, H, num_layers, num_classes = 32, 4, 2, 5

    key = jax.random.PRNGKey(0)
    k_in, k_par = jax.random.split(key)
    x = jax.random.normal(k_in, (B, Cin, L), jnp.float32)
    params = init_params(k_par, Cin, E, H, num_layers, L, num_classes)
    kparams = prepare_params(params, H, L)

    out = convformer_forward(x, kparams, H, num_classes)
    out = jax.block_until_ready(out)
    assert out.shape == (B, num_classes), out.shape
    assert jnp.all(jnp.isfinite(out))
    print("KERNEL_OK")
</pallas_src>

<mosaic_0001>
module attributes {stable_mosaic.version = 11 : i64} {
  func.func @conv_bn_relu_kernel(%arg0: i32, %arg1: memref<32x12xf32, #tpu.memory_space<vmem>>, %arg2: memref<12x32xbf16, #tpu.memory_space<vmem>>, %arg3: memref<1x32xf32, #tpu.memory_space<vmem>>, %arg4: memref<32x32xf32, #tpu.memory_space<vmem>>) attributes {dimension_semantics = [#tpu.dimension_semantics<parallel>], iteration_bounds = array<i64: 1>, scalar_prefetch = 0 : i64, scratch_operands = 0 : i64, tpu.core_type = #tpu.core_type<tc>, window_params = [{transform_indices = @transform_0, window_bounds = array<i64: 32, 12>}, {pipeline_mode = #tpu.pipeline_mode<synchronous>, transform_indices = @transform_1, window_bounds = array<i64: 12, 32>}, {pipeline_mode = #tpu.pipeline_mode<synchronous>, transform_indices = @transform_2, window_bounds = array<i64: 1, 32>}, {transform_indices = @transform_3, window_bounds = array<i64: 32, 32>}]} {
    %c0 = arith.constant 0 : index
    %c0_0 = arith.constant 0 : index
    %0 = vector.load %arg1[%c0, %c0_0] : memref<32x12xf32, #tpu.memory_space<vmem>>, vector<32x12xf32>
    %1 = arith.truncf %0 : vector<32x12xf32> to vector<32x12xbf16>
    %c0_1 = arith.constant 0 : index
    %c0_2 = arith.constant 0 : index
    %2 = vector.load %arg2[%c0_1, %c0_2] : memref<12x32xbf16, #tpu.memory_space<vmem>>, vector<12x32xbf16>
    %cst = arith.constant dense<0.000000e+00> : vector<32x32xf32>
    %3 = tpu.matmul %1, %2, %cst {dimension_numbers = #tpu.dot_dimension_numbers<[1], [0], [0], [1], [0, 0, 1, 1], [], []>} : vector<32x12xbf16>, vector<12x32xbf16>, vector<32x32xf32> -> vector<32x32xf32>
    %c0_3 = arith.constant 0 : index
    %c0_4 = arith.constant 0 : index
    %4 = vector.load %arg3[%c0_3, %c0_4] : memref<1x32xf32, #tpu.memory_space<vmem>>, vector<1x32xf32>
    %5 = vector.broadcast %4 : vector<1x32xf32> to vector<32x32xf32>
    %6 = arith.addf %3, %5 : vector<32x32xf32>
    %cst_5 = arith.constant 0.000000e+00 : f32
    %7 = vector.broadcast %cst_5 : f32 to vector<32x32xf32>
    %8 = arith.maximumf %6, %7 : vector<32x32xf32>
    %c0_6 = arith.constant 0 : index
    %c0_7 = arith.constant 0 : index
    %9 = vector.load %arg4[%c0_6, %c0_7] : memref<32x32xf32, #tpu.memory_space<vmem>>, vector<32x32xf32>
    tpu.vector_store %arg4[%c0_6, %c0_7], %8 {strides = array<i32>} : memref<32x32xf32, #tpu.memory_space<vmem>>, vector<32x32xf32>,
    return
  }
  func.func @transform_0(%arg0: i32) -> (i32, i32) {
    %c0_i32 = arith.constant 0 : i32
    %c0_i32_0 = arith.constant 0 : i32
    return %arg0, %c0_i32 : i32, i32
  }
  func.func @transform_1(%arg0: i32) -> (i32, i32) {
    %c0_i32 = arith.constant 0 : i32
    %c0_i32_0 = arith.constant 0 : i32
    %c0_i32_1 = arith.constant 0 : i32
    return %c0_i32, %c0_i32_0 : i32, i32
  }
  func.func @transform_2(%arg0: i32) -> (i32, i32) {
    %c0_i32 = arith.constant 0 : i32
    %c0_i32_0 = arith.constant 0 : i32
    %c0_i32_1 = arith.constant 0 : i32
    return %c0_i32, %c0_i32_0 : i32, i32
  }
  func.func @transform_3(%arg0: i32) -> (i32, i32) {
    %c0_i32 = arith.constant 0 : i32
    %c0_i32_0 = arith.constant 0 : i32
    return %arg0, %c0_i32 : i32, i32
  }
}

</mosaic_0001>

<bundles_post_ra>
// kernel: tpu_custom_call.1
= control target key start
LH: loop header
LB: loop body
LE: loop exit
PB: predicated region body
PF: predicated region fallthrough
CT: control target
= control target key end

     0   :  { %vm43_vm0 = vcmask 1045504   ;;  %vm36_vm1 = vcmask 97280   ;;  %s209_s0 = inlined_call_operand.vmem [shape: f32[32,12], index: 0, kind: input, shape index: {}]   ;;  %s210_s1 = inlined_call_operand.vmem [shape: bf16[12,32], index: 1, kind: input, shape index: {}]   ;;  %s211_s2 = inlined_call_operand.vmem [shape: f32[1,32], index: 2, kind: input, shape index: {}]   ;;  %s212_s3 = inlined_call_operand.hbm [shape: f32[32,32], index: 3, kind: output, shape index: {}]  }
   0x1   :  { %v138_v0 = vld [vmem:[%s210_s1] sm:$0x3f]   ;;  %v17_v2 = vld [vmem:[%s209_s0 + $0x8] sm:$0xff]  ;;  %v18_v3 = vld [vmem:[%s209_s0 + $0x10] sm:$0xff] }
   0x2   :  { %v16_v1 = vld [vmem:[%s209_s0] sm:$0xff]  ;;  %134 = vmatprep.subr.msk.bf16.mxu0 %vm43_vm0, %v138_v0  ;;  %v45_v4 = vsel %vm43_vm0, %v138_v0, 0  ;;  %v19_v6 = vld [vmem:[%s209_s0 + $0x18] sm:$0xff] }
   0x3   :  { %v20_v5 = vpack.c.bf16 %v17_v2, %v16_v1 }
   0x4   :  { %8 = vsyncpa [#allocation3], 0  ;;  %129 = vmatpush3.bf16.msra.mxu0 %v45_v4  ;;  %v21_v7 = vpack.c.bf16 %v19_v6, %v18_v3  ;;  %v121_v8 = vld [vmem:[%s211_s2] ss:$0 sm:$0xff]  ;;  %vm100_vm2 = vcmask 261120   ;;  %s161_s0 = smov [#allocation2]  }
   0x5   :  { %130 = vmatprep.mubr.msk.bf16.mxu0 %vm36_vm1, %v20_v5  ;;  %s110_s23 = sshll.u32 %s161_s0, 4  ;;  %s111_s23 = int_to_ptr.vmem [resolvable:$true] %s110_s23 }
   0x6   :  { %s139_s2 = scalar_lea.vmem %s111_s23, 512  ;;  %p144_p1 = scmp.lt.s32.totalorder %s111_s23, %s111_s23 }
   0x7   :  { %131 = vmatmul.mubr.msk.bf16.vlgmr.msra.gmra.mxu0 %vm36_vm1, %v21_v7  ;;  %p140_p0 = scmp.ne.s32.totalorder %s111_s23, %s139_s2  ;;  %p145_p2 = scmp.lt.s32.totalorder %s139_s2, %s139_s2 }
   0x9   :  { %p146_p3 = por %p145_p2, %p144_p1 }
   0xb   :  { %p147_p4 = pnand %p146_p3, %p140_p0 }
  0xc7   :  { %v132_v9 = vpop.f32.mrf.mxu0 }
  0xc8   :  { %v90_v10 = vadd.f32 %v132_v9, %v121_v8 }
  0xc9   :  { %v81_v11 = vpop.f32.mrf.mxu0 }
  0xca   :  { %v98_v12 = vmax.f32 %v90_v10, 0.0  ;;  %v82_v13 = vadd.f32 %v121_v8, %v81_v11 }
  0xcb   :  { %v133_v14 = vpop.f32.mrf.mxu0 }
  0xcc   :  { %103 = vst.msk [vmem:[#allocation2 + $0x10] sm:$0xff] %vm100_vm2, %v98_v12  ;;  %v96_v15 = vmax.f32 %v82_v13, 0.0  ;;  %v93_v16 = vadd.f32 %v133_v14, %v121_v8 }
  0xcd   :  { %v84_v17 = vpop.f32.mrf.mxu0 }
  0xce   :  { %101 = vst.msk [vmem:[#allocation2] sm:$0xff] %vm100_vm2, %v96_v15  ;;  %v99_v18 = vmax.f32 %v93_v16, 0.0  ;;  %v85_v19 = vadd.f32 %v121_v8, %v84_v17 }
  0xd0   :  { %104 = vst.msk [vmem:[#allocation2 + $0x18] sm:$0xff] %vm100_vm2, %v99_v18  ;;  %v97_v20 = vmax.f32 %v85_v19, 0.0 }
  0xd2   :  { %102 = vst.msk [vmem:[#allocation2 + $0x8] sm:$0xff] %vm100_vm2, %v97_v20 }
  0xd3   :  { %150 = shalt.err (!%p147_p4)
}
  0xd4   :  { %s162_s24 = smov 128   ;;  %s163_s25 = smov 8  }
  0xd5   :  { %116 = dma.vmem_to_hbm [thread:$0]  %s111_s23, 512, %s212_s3, [#allocation3], %s162_s24, %s162_s24, %s163_s25  }
  0xd6   :  { %159 = dma.done.wait [#allocation3], 512  }
  0xd7   :  { %160 = vsyncadd [#allocation3], 4294966784 }
  0xd8   :  { %120 = vsyncpa [#allocation3], 1 }

</bundles_post_ra>
